<compile_context>
chip_gen: v6e
topology: v6e:2x2x1
jax: 0.10.0
libtpu: 0.0.40
codegen_flags: <defaults>
</compile_context>

<pallas_src>
import jax
import jax.numpy as jnp
from jax.experimental import pallas as pl
from jax.experimental.pallas import tpu as pltpu

HIDDEN1 = 128
HIDDEN2 = 64
LANE = 128                      # TPU lane width (VMEM lane padding granularity)
TILE_B_MAX = 8192               # upper bound on the batch tile
VMEM_BUDGET = 12 * 1024 * 1024  # stay under v5e's 16 MiB default scoped VMEM


def _round_up(x, m):
    return (x + m - 1) // m * m


def mlp_kernel(x_ref, w1_ref, b1_ref, w2_ref, b2_ref, w3_ref, b3_ref, o_ref):
    # One batch tile per grid step; weights/biases are VMEM-resident.
    # Cast x -> bf16 in-kernel (free VPU work hidden under the DMA).
    x = x_ref[...].astype(jnp.bfloat16)                                   # (tile_b, in_dim)

    # fc1 -> ReLU  (bf16 MXU matmul, f32 accumulate, f32 bias)
    h1 = jnp.dot(x, w1_ref[...], preferred_element_type=jnp.float32) + b1_ref[...]
    h1 = jnp.maximum(h1, 0.0).astype(jnp.bfloat16)

    # fc2 -> ReLU
    h2 = jnp.dot(h1, w2_ref[...], preferred_element_type=jnp.float32) + b2_ref[...]
    h2 = jnp.maximum(h2, 0.0).astype(jnp.bfloat16)

    # fc3 -> 255*sigmoid  (true output width, no lane padding of the HBM block)
    logits = jnp.dot(h2, w3_ref[...], preferred_element_type=jnp.float32) + b3_ref[...]
    o_ref[...] = (255.0 * jax.nn.sigmoid(logits)).astype(o_ref.dtype)     # exp on EUP


def _pick_tiling(batch, in_dim, out_dim):
    """Balanced batch tiles under a VMEM budget; >=2 grid steps when possible (v7x dual-TC)."""
    # Per-row VMEM: double-buffered f32 x block + double-buffered f32 out block
    # (out lanes pad to 128 in VMEM regardless of logical out_dim) + intermediates.
    bytes_per_row = (
        2 * in_dim * 4
        + 2 * _round_up(out_dim, LANE) * 4
        + (HIDDEN1 + HIDDEN2) * 6
    )
    cap = min(TILE_B_MAX, max(8, VMEM_BUDGET // bytes_per_row))
    cap = max(8, (cap // 8) * 8)

    # Balanced tiles (bounded padding waste); force >=2 steps for v7x's 2 TCs.
    target_tiles = max(-(-batch // cap), 2 if batch >= 16 else 1)
    tile_b = _round_up(-(-batch // target_tiles), 8)
    grid_n = -(-batch // tile_b)
    b_pad = grid_n * tile_b
    return tile_b, grid_n, b_pad


@jax.jit
def custom_mlp_forward(x, params):
    """x: (batch, in_dim) f32.  params: bf16 weights (pre-transposed), f32 biases."""
    w1, b1, w2, b2, w3, b3 = params
    batch, in_dim = x.shape
    out_dim = w3.shape[1]

    tile_b, grid_n, b_pad = _pick_tiling(batch, in_dim, out_dim)
    xp = jnp.pad(x, ((0, b_pad - batch), (0, 0)))          # no dtype cast here

    resident = lambda i: (0, 0)  # weights/biases: same block every step -> stay in VMEM

    in_specs = [
        pl.BlockSpec((tile_b, in_dim), lambda i: (i, 0)),   # x: tiled over batch (f32)
        pl.BlockSpec((in_dim, HIDDEN1), resident),          # w1 (bf16)
        pl.BlockSpec((1, HIDDEN1), resident),               # b1 (f32)
        pl.BlockSpec((HIDDEN1, HIDDEN2), resident),         # w2 (bf16)
        pl.BlockSpec((1, HIDDEN2), resident),               # b2 (f32)
        pl.BlockSpec((HIDDEN2, out_dim), resident),         # w3 (bf16, true width)
        pl.BlockSpec((1, out_dim), resident),               # b3 (f32, true width)
    ]
    out_spec = pl.BlockSpec((tile_b, out_dim), lambda i: (i, 0))

    flops = 2 * b_pad * (in_dim * HIDDEN1 + HIDDEN1 * HIDDEN2 + HIDDEN2 * out_dim)
    bytes_accessed = (
        b_pad * in_dim * 4                                   # x (f32, read once)
        + (w1.size + w2.size + w3.size) * 2                  # bf16 weights
        + (b1.size + b2.size + b3.size) * 4                  # f32 biases
        + b_pad * out_dim * 4                                # f32 output (un-padded)
    )

    out_padded = pl.pallas_call(
        mlp_kernel,
        out_shape=jax.ShapeDtypeStruct((b_pad, out_dim), jnp.float32),
        grid=(grid_n,),
        in_specs=in_specs,
        out_specs=out_spec,
        compiler_params=pltpu.CompilerParams(
            dimension_semantics=("parallel",),  # batch rows independent (v7x dual-TC shard)
        ),
        cost_estimate=pl.CostEstimate(
            flops=flops,
            transcendentals=b_pad * out_dim,
            bytes_accessed=bytes_accessed,
        ),
    )(xp, w1, b1, w2, b2, w3, b3)

    return out_padded[:batch]   # batch-only slice; feature dim already exact


def init_linear_params(key, fan_in, fan_out):
    """torch.nn.Linear default init: U(-1/sqrt(fan_in), 1/sqrt(fan_in)).

    Weight returned transposed as (fan_in, fan_out) for the x @ W layout.
    """
    kw, kb = jax.random.split(key)
    bound = 1.0 / jnp.sqrt(jnp.float32(fan_in))
    w = jax.random.uniform(kw, (fan_in, fan_out), jnp.float32, -bound, bound)
    b = jax.random.uniform(kb, (1, fan_out), jnp.float32, -bound, bound)
    return w, b


def prepare_params(w1, b1, w2, b2, w3, b3):
    """One-time prep: bf16 weights (MXU-native), f32 biases. Done outside jit."""
    return (
        w1.astype(jnp.bfloat16), b1,
        w2.astype(jnp.bfloat16), b2,
        w3.astype(jnp.bfloat16), b3,
    )


if __name__ == "__main__":
    input_dims = 32
    output_dims = 16
    batch = 8

    key = jax.random.PRNGKey(0)
    k_x, k1, k2, k3 = jax.random.split(key, 4)

    x = jax.random.normal(k_x, (batch, input_dims), jnp.float32)

    w1, b1 = init_linear_params(k1, input_dims, HIDDEN1)
    w2, b2 = init_linear_params(k2, HIDDEN1, HIDDEN2)
    w3, b3 = init_linear_params(k3, HIDDEN2, output_dims)
    params = prepare_params(w1, b1, w2, b2, w3, b3)

    out = custom_mlp_forward(x, params)
    jax.block_until_ready(out)
    assert out.shape == (batch, output_dims)

    # Reference 1: same math as the kernel (bf16 operands, f32 accumulation) -> tight check.
    xb, w1b, w2b, w3b = (a.astype(jnp.bfloat16) for a in (x, w1, w2, w3))
    h1 = jnp.maximum(jnp.dot(xb, w1b, preferred_element_type=jnp.float32) + b1, 0.0)
    h2 = jnp.maximum(
        jnp.dot(h1.astype(jnp.bfloat16), w2b, preferred_element_type=jnp.float32) + b2, 0.0
    )
    lg = jnp.dot(h2.astype(jnp.bfloat16), w3b, preferred_element_type=jnp.float32) + b3
    ref_bf16 = 255.0 * jax.nn.sigmoid(lg)
    assert jnp.allclose(out, ref_bf16, atol=0.1, rtol=1e-3)

    # Reference 2: original f32 module semantics -> loose check (bf16 datapath, 0-255 scale).
    h1f = jnp.maximum(x @ w1 + b1, 0.0)
    h2f = jnp.maximum(h1f @ w2 + b2, 0.0)
    ref_f32 = 255.0 * jax.nn.sigmoid(h2f @ w3 + b3)
    assert jnp.allclose(out, ref_f32, atol=3.0, rtol=3e-2)

    print("KERNEL_OK")
</pallas_src>

<mosaic_0001>
module attributes {stable_mosaic.version = 11 : i64} {
  func.func @mlp_kernel(%arg0: i32, %arg1: memref<8x32xf32, #tpu.memory_space<vmem>>, %arg2: memref<32x128xbf16, #tpu.memory_space<vmem>>, %arg3: memref<1x128xf32, #tpu.memory_space<vmem>>, %arg4: memref<128x64xbf16, #tpu.memory_space<vmem>>, %arg5: memref<1x64xf32, #tpu.memory_space<vmem>>, %arg6: memref<64x16xbf16, #tpu.memory_space<vmem>>, %arg7: memref<1x16xf32, #tpu.memory_space<vmem>>, %arg8: memref<8x16xf32, #tpu.memory_space<vmem>>) attributes {dimension_semantics = [#tpu.dimension_semantics<parallel>], iteration_bounds = array<i64: 1>, scalar_prefetch = 0 : i64, scratch_operands = 0 : i64, tpu.core_type = #tpu.core_type<tc>, window_params = [{transform_indices = @transform_0, window_bounds = array<i64: 8, 32>}, {pipeline_mode = #tpu.pipeline_mode<synchronous>, transform_indices = @transform_1, window_bounds = array<i64: 32, 128>}, {pipeline_mode = #tpu.pipeline_mode<synchronous>, transform_indices = @transform_2, window_bounds = array<i64: 1, 128>}, {pipeline_mode = #tpu.pipeline_mode<synchronous>, transform_indices = @transform_3, window_bounds = array<i64: 128, 64>}, {pipeline_mode = #tpu.pipeline_mode<synchronous>, transform_indices = @transform_4, window_bounds = array<i64: 1, 64>}, {pipeline_mode = #tpu.pipeline_mode<synchronous>, transform_indices = @transform_5, window_bounds = array<i64: 64, 16>}, {pipeline_mode = #tpu.pipeline_mode<synchronous>, transform_indices = @transform_6, window_bounds = array<i64: 1, 16>}, {transform_indices = @transform_7, window_bounds = array<i64: 8, 16>}]} {
    %c0 = arith.constant 0 : index
    %c0_0 = arith.constant 0 : index
    %0 = vector.load %arg1[%c0, %c0_0] : memref<8x32xf32, #tpu.memory_space<vmem>>, vector<8x32xf32>
    %1 = arith.truncf %0 : vector<8x32xf32> to vector<8x32xbf16>
    %c0_1 = arith.constant 0 : index
    %c0_2 = arith.constant 0 : index
    %2 = vector.load %arg2[%c0_1, %c0_2] : memref<32x128xbf16, #tpu.memory_space<vmem>>, vector<32x128xbf16>
    %cst = arith.constant dense<0.000000e+00> : vector<8x128xf32>
    %3 = tpu.matmul %1, %2, %cst {dimension_numbers = #tpu.dot_dimension_numbers<[1], [0], [0], [1], [0, 0, 1, 1], [], []>} : vector<8x32xbf16>, vector<32x128xbf16>, vector<8x128xf32> -> vector<8x128xf32>
    %c0_3 = arith.constant 0 : index
    %c0_4 = arith.constant 0 : index
    %4 = vector.load %arg3[%c0_3, %c0_4] : memref<1x128xf32, #tpu.memory_space<vmem>>, vector<1x128xf32>
    %5 = vector.broadcast %4 : vector<1x128xf32> to vector<8x128xf32>
    %6 = arith.addf %3, %5 : vector<8x128xf32>
    %cst_5 = arith.constant 0.000000e+00 : f32
    %7 = vector.broadcast %cst_5 : f32 to vector<8x128xf32>
    %8 = arith.maximumf %6, %7 : vector<8x128xf32>
    %9 = arith.truncf %8 : vector<8x128xf32> to vector<8x128xbf16>
    %c0_6 = arith.constant 0 : index
    %c0_7 = arith.constant 0 : index
    %10 = vector.load %arg4[%c0_6, %c0_7] : memref<128x64xbf16, #tpu.memory_space<vmem>>, vector<128x64xbf16>
    %cst_8 = arith.constant dense<0.000000e+00> : vector<8x64xf32>
    %11 = tpu.matmul %9, %10, %cst_8 {dimension_numbers = #tpu.dot_dimension_numbers<[1], [0], [0], [1], [0, 0, 1, 1], [], []>} : vector<8x128xbf16>, vector<128x64xbf16>, vector<8x64xf32> -> vector<8x64xf32>
    %c0_9 = arith.constant 0 : index
    %c0_10 = arith.constant 0 : index
    %12 = vector.load %arg5[%c0_9, %c0_10] : memref<1x64xf32, #tpu.memory_space<vmem>>, vector<1x64xf32>
    %13 = vector.broadcast %12 : vector<1x64xf32> to vector<8x64xf32>
    %14 = arith.addf %11, %13 : vector<8x64xf32>
    %cst_11 = arith.constant 0.000000e+00 : f32
    %15 = vector.broadcast %cst_11 : f32 to vector<8x64xf32>
    %16 = arith.maximumf %14, %15 : vector<8x64xf32>
    %17 = arith.truncf %16 : vector<8x64xf32> to vector<8x64xbf16>
    %c0_12 = arith.constant 0 : index
    %c0_13 = arith.constant 0 : index
    %18 = vector.load %arg6[%c0_12, %c0_13] : memref<64x16xbf16, #tpu.memory_space<vmem>>, vector<64x16xbf16>
    %cst_14 = arith.constant dense<0.000000e+00> : vector<8x16xf32>
    %19 = tpu.matmul %17, %18, %cst_14 {dimension_numbers = #tpu.dot_dimension_numbers<[1], [0], [0], [1], [0, 0, 1, 1], [], []>} : vector<8x64xbf16>, vector<64x16xbf16>, vector<8x16xf32> -> vector<8x16xf32>
    %c0_15 = arith.constant 0 : index
    %c0_16 = arith.constant 0 : index
    %20 = vector.load %arg7[%c0_15, %c0_16] : memref<1x16xf32, #tpu.memory_space<vmem>>, vector<1x16xf32>
    %21 = vector.broadcast %20 : vector<1x16xf32> to vector<8x16xf32>
    %22 = arith.addf %19, %21 : vector<8x16xf32>
    %23 = arith.negf %22 : vector<8x16xf32>
    %24 = math.exp %23 : vector<8x16xf32>
    %cst_17 = arith.constant 1.000000e+00 : f32
    %25 = vector.broadcast %cst_17 : f32 to vector<8x16xf32>
    %26 = arith.addf %25, %24 : vector<8x16xf32>
    %27 = arith.divf %25, %26 : vector<8x16xf32>
    %cst_18 = arith.constant 2.550000e+02 : f32
    %28 = vector.broadcast %cst_18 : f32 to vector<8x16xf32>
    %29 = arith.mulf %28, %27 : vector<8x16xf32>
    %c0_19 = arith.constant 0 : index
    %c0_20 = arith.constant 0 : index
    %30 = vector.load %arg8[%c0_19, %c0_20] : memref<8x16xf32, #tpu.memory_space<vmem>>, vector<8x16xf32>
    tpu.vector_store %arg8[%c0_19, %c0_20], %29 {strides = array<i32>} : memref<8x16xf32, #tpu.memory_space<vmem>>, vector<8x16xf32>,
    return
  }
  func.func @transform_0(%arg0: i32) -> (i32, i32) {
    %c0_i32 = arith.constant 0 : i32
    %c0_i32_0 = arith.constant 0 : i32
    return %arg0, %c0_i32 : i32, i32
  }
  func.func @transform_1(%arg0: i32) -> (i32, i32) {
    %c0_i32 = arith.constant 0 : i32
    %c0_i32_0 = arith.constant 0 : i32
    %c0_i32_1 = arith.constant 0 : i32
    return %c0_i32, %c0_i32_0 : i32, i32
  }
  func.func @transform_2(%arg0: i32) -> (i32, i32) {
    %c0_i32 = arith.constant 0 : i32
    %c0_i32_0 = arith.constant 0 : i32
    %c0_i32_1 = arith.constant 0 : i32
    return %c0_i32, %c0_i32_0 : i32, i32
  }
  func.func @transform_3(%arg0: i32) -> (i32, i32) {
    %c0_i32 = arith.constant 0 : i32
    %c0_i32_0 = arith.constant 0 : i32
    %c0_i32_1 = arith.constant 0 : i32
    return %c0_i32, %c0_i32_0 : i32, i32
  }
  func.func @transform_4(%arg0: i32) -> (i32, i32) {
    %c0_i32 = arith.constant 0 : i32
    %c0_i32_0 = arith.constant 0 : i32
    %c0_i32_1 = arith.constant 0 : i32
    return %c0_i32, %c0_i32_0 : i32, i32
  }
  func.func @transform_5(%arg0: i32) -> (i32, i32) {
    %c0_i32 = arith.constant 0 : i32
    %c0_i32_0 = arith.constant 0 : i32
    %c0_i32_1 = arith.constant 0 : i32
    return %c0_i32, %c0_i32_0 : i32, i32
  }
  func.func @transform_6(%arg0: i32) -> (i32, i32) {
    %c0_i32 = arith.constant 0 : i32
    %c0_i32_0 = arith.constant 0 : i32
    %c0_i32_1 = arith.constant 0 : i32
    return %c0_i32, %c0_i32_0 : i32, i32
  }
  func.func @transform_7(%arg0: i32) -> (i32, i32) {
    %c0_i32 = arith.constant 0 : i32
    %c0_i32_0 = arith.constant 0 : i32
    return %arg0, %c0_i32 : i32, i32
  }
}

</mosaic_0001>

<bundles_post_ra>
// kernel: custom_mlp_forward.1
= control target key start
LH: loop header
LB: loop body
LE: loop exit
PB: predicated region body
PF: predicated region fallthrough
CT: control target
= control target key end

     0   :  { %v438_v1 = vmov 0.0   ;;  %vm439_vm0 = vmmov 0   ;;  %vm53_vm1 = vcmask 261120   ;;  %s541_s0 = inlined_call_operand.vmem [shape: f32[8,32], index: 0, kind: input, shape index: {}]   ;;  %s542_s1 = inlined_call_operand.vmem [shape: bf16[32,128], index: 1, kind: input, shape index: {}]   ;;  %s543_s2 = inlined_call_operand.vmem [shape: f32[1,128], index: 2, kind: input, shape index: {}]   ;;  %s544_s3 = inlined_call_operand.vmem [shape: bf16[128,64], index: 3, kind: input, shape index: {}]   ;;  %s545_s4 = inlined_call_operand.vmem [shape: f32[1,64], index: 4, kind: input, shape index: {}]   ;;  %s546_s5 = inlined_call_operand.vmem [shape: bf16[64,16], index: 5, kind: input, shape index: {}]   ;;  %s547_s6 = inlined_call_operand.vmem [shape: f32[1,16], index: 6, kind: input, shape index: {}]   ;;  %s548_s7 = inlined_call_operand.hbm [shape: f32[8,16], index: 7, kind: output, shape index: {}]  }
   0x1   :  { %v398_v0 = vld [vmem:[%s542_s1 + $0x8] sm:$0xff]   ;;  %355 = vmatprep.subr.bf16.mxu0 %v438_v1  ;;  %v399_v2 = vld [vmem:[%s542_s1] sm:$0xff]   ;;  %363 = vmatprep.subr.bf16.mxu1 %v438_v1  ;;  %v400_v4 = vld [vmem:[%s544_s3 + $0x38] sm:$0xff]  }
   0x2   :  { %356 = vmatpush3.bf16.msra.mxu0 %v398_v0  ;;  %359 = vmatprep.mubr.msk.bf16.mxu0 %vm439_vm0, %v438_v1  ;;  %v28_v3 = vld [vmem:[%s541_s0] sm:$0xff]  ;;  %v401_v6 = vld [vmem:[%s544_s3 + $0x30] sm:$0xff]   ;;  %v402_v7 = vld [vmem:[%s544_s3 + $0x28] sm:$0xff]  }
   0x3   :  { %357 = vmatprep.subr.bf16.mxu0 %v438_v1  ;;  %379 = vmatprep.mubr.msk.bf16.mxu1 %vm439_vm0, %v438_v1  ;;  %v29_v5 = vpack.c.bf16 %v28_v3, %v28_v3 }
   0x4   :  { %364 = vmatpush3.bf16.msra.mxu1 %v400_v4 }
   0x5   :  { %365 = vmatprep.subr.bf16.mxu1 %v438_v1 }
   0x6   :  { %358 = vmatpush3.bf16.msra.mxu0 %v399_v2 }
   0x7   :  { %383 = vmatprep.subr.bf16.mxu0 %v438_v1 }
   0x8   :  { %366 = vmatpush3.bf16.msra.mxu1 %v401_v6 }
   0x9   :  { %360 = vmatmul.mubr.msk.bf16.vlgmr.msra.gmra.mxu0 %vm53_vm1, %v29_v5  ;;  %367 = vmatprep.subr.bf16.mxu1 %v438_v1 }
   0xa   :  { %391 = vmatprep.mubr.msk.bf16.mxu0 %vm439_vm0, %v438_v1 }
   0xb   :  { %12 = vsyncpa [#allocation3], 0  ;;  %v403_v8 = vld [vmem:[%s544_s3 + $0x20] sm:$0xff]   ;;  %v404_v9 = vld [vmem:[%s544_s3 + $0x18] sm:$0xff]   ;;  %vm251_vm2 = vcmask 523264   ;;  %vm302_vm3 = vcmask 130048  }
   0xc   :  { %368 = vmatpush3.bf16.msra.mxu1 %v402_v7  ;;  %v405_v10 = vld [vmem:[%s544_s3 + $0x10] sm:$0xff]   ;;  %v406_v11 = vld [vmem:[%s544_s3 + $0x8] sm:$0xff]   ;;  %v407_v12 = vld [vmem:[%s544_s3] sm:$0xff]  }
   0xd   :  { %369 = vmatprep.subr.bf16.mxu1 %v438_v1  ;;  %v408_v13 = vld [vmem:[%s546_s5 + $0x18] sm:$0xff]   ;;  %v409_v14 = vld [vmem:[%s546_s5 + $0x10] sm:$0xff]   ;;  %v318_v15 = vld [vmem:[%s543_s2] ss:$0 sm:$0xff] }
   0xe   :  { %384 = vmatpush3.bf16.msra.mxu0 %v408_v13  ;;  %v410_v23 = vld [vmem:[%s546_s5 + $0x8] sm:$0xff]   ;;  %v411_v24 = vld [vmem:[%s546_s5] sm:$0xff]  }
   0xf   :  { %385 = vmatprep.subr.bf16.mxu0 %v438_v1  ;;  %v322_v25 = vld [vmem:[%s545_s4] ss:$0 sm:$0xff]  ;;  %s440_s4 = smov [#allocation2]  }
  0x10   :  { %370 = vmatpush3.bf16.msra.mxu1 %v403_v8  ;;  %v331_v33 = vld [vmem:[%s547_s6] ss:$0 sm:$0xff]  ;;  %s310_s5 = sshll.u32 %s440_s4, 4  ;;  %s311_s5 = int_to_ptr.vmem [resolvable:$true] %s310_s5 }
  0x11   :  { %371 = vmatprep.subr.bf16.mxu1 %v438_v1  ;;  %s416_s1 = scalar_lea.vmem %s311_s5, 128  ;;  %p421_p1 = scmp.lt.s32.totalorder %s311_s5, %s311_s5 }
  0x12   :  { %386 = vmatpush3.bf16.msra.mxu0 %v409_v14  ;;  %p417_p0 = scmp.ne.s32.totalorder %s311_s5, %s416_s1  ;;  %p422_p2 = scmp.lt.s32.totalorder %s416_s1, %s416_s1 }
  0x13   :  { %387 = vmatprep.subr.bf16.mxu0 %v438_v1 }
  0x14   :  { %372 = vmatpush3.bf16.msra.mxu1 %v404_v9  ;;  %p423_p3 = por %p422_p2, %p421_p1 }
  0x15   :  { %373 = vmatprep.subr.bf16.mxu1 %v438_v1 }
  0x16   :  { %388 = vmatpush3.bf16.msra.mxu0 %v410_v23  ;;  %p424_p4 = pnand %p423_p3, %p417_p0 }
  0x17   :  { %389 = vmatprep.subr.bf16.mxu0 %v438_v1 }
  0x18   :  { %374 = vmatpush3.bf16.msra.mxu1 %v405_v10 }
  0x19   :  { %375 = vmatprep.subr.bf16.mxu1 %v438_v1 }
  0x1a   :  { %390 = vmatpush3.bf16.msra.mxu0 %v411_v24 }
  0x1c   :  { %376 = vmatpush3.bf16.msra.mxu1 %v406_v11 }
  0x1d   :  { %377 = vmatprep.subr.bf16.mxu1 %v438_v1 }
  0x20   :  { %378 = vmatpush3.bf16.msra.mxu1 %v407_v12 }
  0xc9   :  { %v91_v16 = vpop.f32.mrf.mxu0 }
  0xca   :  { %v92_v17 = vadd.f32 %v318_v15, %v91_v16 }
  0xcb   :  { %v361_v18 = vpop.f32.mrf.mxu0 }
  0xcc   :  { %v97_v19 = vmax.f32 %v92_v17, 0.0 }
  0xcd   :  { %v94_v20 = vpop.f32.mrf.mxu0 }
  0xce   :  { %v98_v21 = vpack.c.bf16 %v97_v19, %v97_v19 }
  0xcf   :  { %v362_v22 = vpop.f32.mrf.mxu0 }
  0xd0   :  { %380 = vmatmul.mubr.bf16.vlgmr.msra.gmra.mxu1 %v98_v21 }
 0x190   :  { %v204_v26 = vpop.f32.mrf.mxu1 }
 0x191   :  { %v205_v27 = vadd.f32 %v322_v25, %v204_v26 }
 0x192   :  { %v381_v28 = vpop.f32.mrf.mxu1 }
 0x193   :  { %v210_v29 = vmax.f32 %v205_v27, 0.0 }
 0x194   :  { %v207_v30 = vpop.f32.mrf.mxu1 }
 0x195   :  { %v211_v31 = vpack.c.bf16 %v210_v29, %v210_v29 }
 0x196   :  { %v382_v32 = vpop.f32.mrf.mxu1 }
 0x197   :  { %392 = vmatmul.mubr.msk.bf16.vlgmr.msra.gmra.mxu0 %vm251_vm2, %v211_v31 }
 0x257   :  { %v289_v34 = vpop.f32.mrf.mxu0 }
 0x258   :  { %v290_v35 = vadd.f32 %v331_v33, %v289_v34 }
 0x259   :  { %v393_v36 = vpop.f32.mrf.mxu0 }
 0x25a   :  { %v337_v37 = vmul.f32 -1.442695, %v290_v35 }
 0x25b   :  { %v292_v38 = vpop.f32.mrf.mxu0 }
 0x25c   :  { %412 = vpow2.f32 %v337_v37 }
 0x25d   :  { %v394_v39 = vpop.f32.mrf.mxu0 }
 0x269   :  { %v413_v40 = vpop.eup %412 }
 0x26a   :  { %v298_v41 = vadd.f32 1.0, %v413_v40 }
 0x26c   :  { %414 = vrcp.f32 %v298_v41 }
 0x279   :  { %v415_v42 = vpop.eup %414 }
 0x27a   :  { %v301_v43 = vmul.f32 255.0, %v415_v42 }
 0x27c   :  { %303 = vst.msk [vmem:[#allocation2] sm:$0xff] %vm302_vm3, %v301_v43 }
 0x27d   :  { %427 = shalt.err (!%p424_p4)
}
 0x27e   :  { %313 = dma.vmem_to_hbm [thread:$0]  %s311_s5, 128, %s548_s7, [#allocation3]  }
 0x27f   :  { %436 = dma.done.wait [#allocation3], 128  }
 0x280   :  { %437 = vsyncadd [#allocation3], 4294967168 }
 0x281   :  { %317 = vsyncpa [#allocation3], 1 }

</bundles_post_ra>
